<compile_context>
chip_gen: v7x
topology: tpu7x:2x2x1
jax: 0.10.0
libtpu: 0.0.40
codegen_flags: <defaults>
</compile_context>

<pallas_src>
import functools
import numpy as np

import jax
import jax.numpy as jnp
from jax.experimental import pallas as pl
from jax.experimental.pallas import tpu as pltpu


def _mha_kernel(q_in_ref, k_in_ref, v_in_ref,
                wq_ref, bq_ref, wk_ref, bk_ref, wv_ref, bv_ref,
                wo_ref, bo_ref, gamma_ref, beta_ref,
                out_ref,
                *, h, d_k, d_v, eps):
    # One grid step = (one batch element, one query tile). K/V blocks carry the full key
    # sequence for that batch element and are re-used (same block index) across q tiles.
    # TODO(synk): for long sequences add a kv-tile grid axis with flash-style online softmax
    # (m/l/acc scratch + pl.when init/finalize) so scores are not materialized as (h, tq, nk).
    queries = q_in_ref[0]          # (tq, d_model)  f32
    keys    = k_in_ref[0]          # (nk, d_model)  f32
    values  = v_in_ref[0]          # (nk, d_model)  f32

    tq = queries.shape[0]
    nk = keys.shape[0]
    bf16 = jnp.bfloat16
    f32 = jnp.float32

    # --- input projections: bf16 operands, f32 accumulation on the MXU ---
    q = jnp.dot(queries.astype(bf16), wq_ref[...],
                preferred_element_type=f32) + bq_ref[...]           # (tq, h*d_k) f32
    k = jnp.dot(keys.astype(bf16), wk_ref[...],
                preferred_element_type=f32) + bk_ref[...]           # (nk, h*d_k) f32
    v = jnp.dot(values.astype(bf16), wv_ref[...],
                preferred_element_type=f32) + bv_ref[...]           # (nk, h*d_v) f32

    # Fold 1/sqrt(d_k) into Q (cheaper than scaling the (h, tq, nk) score matrix).
    scale = 1.0 / float(np.sqrt(d_k))

    # Split heads once and put the head axis in front (canonical batched-matmul layout).
    qh = jnp.transpose((q * scale).reshape(tq, h, d_k), (1, 0, 2)).astype(bf16)  # (h, tq, d_k)
    kh = jnp.transpose(k.reshape(nk, h, d_k), (1, 0, 2)).astype(bf16)            # (h, nk, d_k)
    vh = jnp.transpose(v.reshape(nk, h, d_v), (1, 0, 2)).astype(bf16)            # (h, nk, d_v)

    # --- all heads at once: batched QK^T (no explicit .T), softmax in f32, batched PV ---
    scores = jnp.einsum('hqd,hkd->hqk', qh, kh, preferred_element_type=f32)      # (h, tq, nk) f32
    m = jnp.max(scores, axis=-1, keepdims=True)
    e = jnp.exp(scores - m)
    denom = jnp.sum(e, axis=-1, keepdims=True)
    probs = e * pl.reciprocal(denom, approx=True)   # EUP reciprocal; frees VALU slots
    # dropout(p=0.1) is identity in eval mode

    ctx = jnp.einsum('hqk,hkd->hqd', probs.astype(bf16), vh,
                     preferred_element_type=f32)                                  # (h, tq, d_v) f32
    o = jnp.transpose(ctx, (1, 0, 2)).reshape(tq, h * d_v).astype(bf16)           # (tq, h*d_v) bf16

    # --- output projection ---
    o = jnp.dot(o, wo_ref[...], preferred_element_type=f32) + bo_ref[...]         # (tq, d_model) f32

    # --- residual + LayerNorm over d_model (all f32) ---
    x = queries + o
    mean = jnp.mean(x, axis=-1, keepdims=True)
    cen = x - mean
    var = jnp.mean(cen * cen, axis=-1, keepdims=True)
    out_ref[0] = (cen * jax.lax.rsqrt(var + eps)) * gamma_ref[...] + beta_ref[...]


def mha_pallas(queries, keys, values, params, *, h, d_k, d_v, eps=1e-5, q_tile=128):
    b_s, nq, d_model = queries.shape
    nk = keys.shape[1]

    # Query-tile grid axis (second "parallel" axis — helps megacore / v7x 2-TC sharding).
    tq = nq if nq <= q_tile else q_tile
    assert nq % tq == 0, "pad nq to a multiple of the query tile"
    n_qt = nq // tq

    bf16 = jnp.bfloat16
    kernel = functools.partial(_mha_kernel, h=h, d_k=d_k, d_v=d_v, eps=eps)

    # Weights / biases / LN params use a constant index_map -> block index never changes,
    # so Pallas keeps them resident in VMEM across all grid steps (no per-step re-DMA).
    resident = lambda shape: pl.BlockSpec(shape, lambda b, qi: (0, 0))

    grid_spec = pltpu.PrefetchScalarGridSpec(
        num_scalar_prefetch=0,
        grid=(b_s, n_qt),
        in_specs=[
            pl.BlockSpec((1, tq, d_model), lambda b, qi: (b, qi, 0)),   # queries tile
            pl.BlockSpec((1, nk, d_model), lambda b, qi: (b, 0, 0)),    # keys (full seq, reused across q tiles)
            pl.BlockSpec((1, nk, d_model), lambda b, qi: (b, 0, 0)),    # values
            resident((d_model, h * d_k)),  # Wq^T (bf16)
            resident((1, h * d_k)),        # bq   (f32)
            resident((d_model, h * d_k)),  # Wk^T (bf16)
            resident((1, h * d_k)),        # bk
            resident((d_model, h * d_v)),  # Wv^T (bf16)
            resident((1, h * d_v)),        # bv
            resident((h * d_v, d_model)),  # Wo^T (bf16)
            resident((1, d_model)),        # bo
            resident((1, d_model)),        # layernorm gamma
            resident((1, d_model)),        # layernorm beta
        ],
        out_specs=pl.BlockSpec((1, tq, d_model), lambda b, qi: (b, qi, 0)),
    )

    return pl.pallas_call(
        kernel,
        out_shape=jax.ShapeDtypeStruct((b_s, nq, d_model), jnp.float32),
        grid_spec=grid_spec,
        compiler_params=pltpu.CompilerParams(
            dimension_semantics=("parallel", "parallel"),
            vmem_limit_bytes=32 * 1024 * 1024),   # safe on v5e/v6e/v7x scoped VMEM
    )(queries, keys, values,
      params["wq"].astype(bf16), params["bq"],
      params["wk"].astype(bf16), params["bk"],
      params["wv"].astype(bf16), params["bv"],
      params["wo"].astype(bf16), params["bo"],
      params["gamma"], params["beta"])


def _xavier_uniform(key, out_features, in_features):
    # matches nn.init.xavier_uniform_ on a (out, in) weight; return transposed (in, out)
    bound = float(np.sqrt(6.0 / (in_features + out_features)))
    w = jax.random.uniform(key, (out_features, in_features), jnp.float32, -bound, bound)
    return w.T


def make_params(key, d_model, d_k, d_v, h):
    ks = jax.random.split(key, 4)
    return {
        "wq": _xavier_uniform(ks[0], h * d_k, d_model),
        "bq": jnp.zeros((1, h * d_k), jnp.float32),
        "wk": _xavier_uniform(ks[1], h * d_k, d_model),
        "bk": jnp.zeros((1, h * d_k), jnp.float32),
        "wv": _xavier_uniform(ks[2], h * d_v, d_model),
        "bv": jnp.zeros((1, h * d_v), jnp.float32),
        "wo": _xavier_uniform(ks[3], d_model, h * d_v),
        "bo": jnp.zeros((1, d_model), jnp.float32),
        "gamma": jnp.ones((1, d_model), jnp.float32),   # nn.LayerNorm default init
        "beta": jnp.zeros((1, d_model), jnp.float32),
    }


def mha_reference(queries, keys, values, params, *, h, d_k, d_v, eps=1e-5):
    # Pure-JAX f32 reference mirroring the PyTorch forward (eval mode).
    b_s, nq, d_model = queries.shape
    nk = keys.shape[1]
    q = (queries @ params["wq"] + params["bq"]).reshape(b_s, nq, h, d_k).transpose(0, 2, 1, 3)
    k = (keys @ params["wk"] + params["bk"]).reshape(b_s, nk, h, d_k).transpose(0, 2, 3, 1)
    v = (values @ params["wv"] + params["bv"]).reshape(b_s, nk, h, d_v).transpose(0, 2, 1, 3)
    att = jnp.einsum("bhqd,bhdk->bhqk", q, k) / np.sqrt(d_k)
    att = jax.nn.softmax(att, axis=-1)
    out = jnp.einsum("bhqk,bhkd->bhqd", att, v).transpose(0, 2, 1, 3).reshape(b_s, nq, h * d_v)
    out = out @ params["wo"] + params["bo"]
    x = queries + out
    mean = x.mean(-1, keepdims=True)
    var = ((x - mean) ** 2).mean(-1, keepdims=True)
    return (x - mean) / jnp.sqrt(var + eps) * params["gamma"] + params["beta"]


if __name__ == "__main__":
    # Small shapes consistent with the module: batch=2, seq=8, d_model=32, h=4, d_k=d_v=8
    b_s, nq, nk = 2, 8, 8
    d_model, d_k, d_v, h = 32, 8, 8, 4

    key = jax.random.PRNGKey(0)
    kq, kk, kv, kp = jax.random.split(key, 4)
    queries = jax.random.normal(kq, (b_s, nq, d_model), jnp.float32)
    keys    = jax.random.normal(kk, (b_s, nk, d_model), jnp.float32)
    values  = jax.random.normal(kv, (b_s, nk, d_model), jnp.float32)
    params = make_params(kp, d_model, d_k, d_v, h)

    out = mha_pallas(queries, keys, values, params, h=h, d_k=d_k, d_v=d_v)
    out = jax.block_until_ready(out)

    ref = mha_reference(queries, keys, values, params, h=h, d_k=d_k, d_v=d_v)
    # bf16 matmul operands (f32 accumulation) vs pure-f32 reference: tolerance loosened accordingly.
    np.testing.assert_allclose(np.asarray(out), np.asarray(ref), rtol=5e-2, atol=5e-2)

    print("KERNEL_OK")
</pallas_src>

<mosaic_0001>
module attributes {stable_mosaic.version = 11 : i64} {
  func.func @_mha_kernel(%arg0: i32, %arg1: i32, %arg2: memref<1x8x32xf32, #tpu.memory_space<vmem>>, %arg3: memref<1x8x32xf32, #tpu.memory_space<vmem>>, %arg4: memref<1x8x32xf32, #tpu.memory_space<vmem>>, %arg5: memref<32x32xbf16, #tpu.memory_space<vmem>>, %arg6: memref<1x32xf32, #tpu.memory_space<vmem>>, %arg7: memref<32x32xbf16, #tpu.memory_space<vmem>>, %arg8: memref<1x32xf32, #tpu.memory_space<vmem>>, %arg9: memref<32x32xbf16, #tpu.memory_space<vmem>>, %arg10: memref<1x32xf32, #tpu.memory_space<vmem>>, %arg11: memref<32x32xbf16, #tpu.memory_space<vmem>>, %arg12: memref<1x32xf32, #tpu.memory_space<vmem>>, %arg13: memref<1x32xf32, #tpu.memory_space<vmem>>, %arg14: memref<1x32xf32, #tpu.memory_space<vmem>>, %arg15: memref<1x8x32xf32, #tpu.memory_space<vmem>>) attributes {dimension_semantics = [#tpu.dimension_semantics<parallel>, #tpu.dimension_semantics<parallel>], iteration_bounds = array<i64: 2, 1>, scalar_prefetch = 0 : i64, scratch_operands = 0 : i64, tpu.core_type = #tpu.core_type<tc>, window_params = [{transform_indices = @transform_0, window_bounds = array<i64: 1, 8, 32>}, {transform_indices = @transform_1, window_bounds = array<i64: 1, 8, 32>}, {transform_indices = @transform_2, window_bounds = array<i64: 1, 8, 32>}, {pipeline_mode = #tpu.pipeline_mode<synchronous>, transform_indices = @transform_3, window_bounds = array<i64: 32, 32>}, {pipeline_mode = #tpu.pipeline_mode<synchronous>, transform_indices = @transform_4, window_bounds = array<i64: 1, 32>}, {pipeline_mode = #tpu.pipeline_mode<synchronous>, transform_indices = @transform_5, window_bounds = array<i64: 32, 32>}, {pipeline_mode = #tpu.pipeline_mode<synchronous>, transform_indices = @transform_6, window_bounds = array<i64: 1, 32>}, {pipeline_mode = #tpu.pipeline_mode<synchronous>, transform_indices = @transform_7, window_bounds = array<i64: 32, 32>}, {pipeline_mode = #tpu.pipeline_mode<synchronous>, transform_indices = @transform_8, window_bounds = array<i64: 1, 32>}, {pipeline_mode = #tpu.pipeline_mode<synchronous>, transform_indices = @transform_9, window_bounds = array<i64: 32, 32>}, {pipeline_mode = #tpu.pipeline_mode<synchronous>, transform_indices = @transform_10, window_bounds = array<i64: 1, 32>}, {pipeline_mode = #tpu.pipeline_mode<synchronous>, transform_indices = @transform_11, window_bounds = array<i64: 1, 32>}, {pipeline_mode = #tpu.pipeline_mode<synchronous>, transform_indices = @transform_12, window_bounds = array<i64: 1, 32>}, {transform_indices = @transform_13, window_bounds = array<i64: 1, 8, 32>}]} {
    %c0 = arith.constant 0 : index
    %c0_0 = arith.constant 0 : index
    %c0_1 = arith.constant 0 : index
    %0 = vector.load %arg2[%c0, %c0_0, %c0_1] : memref<1x8x32xf32, #tpu.memory_space<vmem>>, vector<1x8x32xf32>
    %1 = vector.shape_cast %0 : vector<1x8x32xf32> to vector<8x32xf32>
    %c0_2 = arith.constant 0 : index
    %c0_3 = arith.constant 0 : index
    %c0_4 = arith.constant 0 : index
    %2 = vector.load %arg3[%c0_2, %c0_3, %c0_4] : memref<1x8x32xf32, #tpu.memory_space<vmem>>, vector<1x8x32xf32>
    %3 = vector.shape_cast %2 : vector<1x8x32xf32> to vector<8x32xf32>
    %c0_5 = arith.constant 0 : index
    %c0_6 = arith.constant 0 : index
    %c0_7 = arith.constant 0 : index
    %4 = vector.load %arg4[%c0_5, %c0_6, %c0_7] : memref<1x8x32xf32, #tpu.memory_space<vmem>>, vector<1x8x32xf32>
    %5 = vector.shape_cast %4 : vector<1x8x32xf32> to vector<8x32xf32>
    %6 = arith.truncf %1 : vector<8x32xf32> to vector<8x32xbf16>
    %c0_8 = arith.constant 0 : index
    %c0_9 = arith.constant 0 : index
    %7 = vector.load %arg5[%c0_8, %c0_9] : memref<32x32xbf16, #tpu.memory_space<vmem>>, vector<32x32xbf16>
    %cst = arith.constant dense<0.000000e+00> : vector<8x32xf32>
    %8 = tpu.matmul %6, %7, %cst {dimension_numbers = #tpu.dot_dimension_numbers<[1], [0], [0], [1], [0, 0, 1, 1], [], []>} : vector<8x32xbf16>, vector<32x32xbf16>, vector<8x32xf32> -> vector<8x32xf32>
    %c0_10 = arith.constant 0 : index
    %c0_11 = arith.constant 0 : index
    %9 = vector.load %arg6[%c0_10, %c0_11] : memref<1x32xf32, #tpu.memory_space<vmem>>, vector<1x32xf32>
    %10 = vector.broadcast %9 : vector<1x32xf32> to vector<8x32xf32>
    %11 = arith.addf %8, %10 : vector<8x32xf32>
    %12 = arith.truncf %3 : vector<8x32xf32> to vector<8x32xbf16>
    %c0_12 = arith.constant 0 : index
    %c0_13 = arith.constant 0 : index
    %13 = vector.load %arg7[%c0_12, %c0_13] : memref<32x32xbf16, #tpu.memory_space<vmem>>, vector<32x32xbf16>
    %cst_14 = arith.constant dense<0.000000e+00> : vector<8x32xf32>
    %14 = tpu.matmul %12, %13, %cst_14 {dimension_numbers = #tpu.dot_dimension_numbers<[1], [0], [0], [1], [0, 0, 1, 1], [], []>} : vector<8x32xbf16>, vector<32x32xbf16>, vector<8x32xf32> -> vector<8x32xf32>
    %c0_15 = arith.constant 0 : index
    %c0_16 = arith.constant 0 : index
    %15 = vector.load %arg8[%c0_15, %c0_16] : memref<1x32xf32, #tpu.memory_space<vmem>>, vector<1x32xf32>
    %16 = vector.broadcast %15 : vector<1x32xf32> to vector<8x32xf32>
    %17 = arith.addf %14, %16 : vector<8x32xf32>
    %18 = arith.truncf %5 : vector<8x32xf32> to vector<8x32xbf16>
    %c0_17 = arith.constant 0 : index
    %c0_18 = arith.constant 0 : index
    %19 = vector.load %arg9[%c0_17, %c0_18] : memref<32x32xbf16, #tpu.memory_space<vmem>>, vector<32x32xbf16>
    %cst_19 = arith.constant dense<0.000000e+00> : vector<8x32xf32>
    %20 = tpu.matmul %18, %19, %cst_19 {dimension_numbers = #tpu.dot_dimension_numbers<[1], [0], [0], [1], [0, 0, 1, 1], [], []>} : vector<8x32xbf16>, vector<32x32xbf16>, vector<8x32xf32> -> vector<8x32xf32>
    %c0_20 = arith.constant 0 : index
    %c0_21 = arith.constant 0 : index
    %21 = vector.load %arg10[%c0_20, %c0_21] : memref<1x32xf32, #tpu.memory_space<vmem>>, vector<1x32xf32>
    %22 = vector.broadcast %21 : vector<1x32xf32> to vector<8x32xf32>
    %23 = arith.addf %20, %22 : vector<8x32xf32>
    %cst_22 = arith.constant 0.353553385 : f32
    %24 = vector.broadcast %cst_22 : f32 to vector<8x32xf32>
    %25 = arith.mulf %11, %24 : vector<8x32xf32>
    %26 = vector.shape_cast %25 : vector<8x32xf32> to vector<8x4x8xf32>
    %27 = tpu.transpose %26, [1, 0, 2] : vector<8x4x8xf32> -> vector<4x8x8xf32>
    %28 = arith.truncf %27 : vector<4x8x8xf32> to vector<4x8x8xbf16>
    %29 = vector.shape_cast %17 : vector<8x32xf32> to vector<8x4x8xf32>
    %30 = tpu.transpose %29, [1, 0, 2] : vector<8x4x8xf32> -> vector<4x8x8xf32>
    %31 = arith.truncf %30 : vector<4x8x8xf32> to vector<4x8x8xbf16>
    %32 = vector.shape_cast %23 : vector<8x32xf32> to vector<8x4x8xf32>
    %33 = tpu.transpose %32, [1, 0, 2] : vector<8x4x8xf32> -> vector<4x8x8xf32>
    %34 = arith.truncf %33 : vector<4x8x8xf32> to vector<4x8x8xbf16>
    "tpu.trace_start"() <{level = 10 : i32, message = "hqd,hkd->hqk"}> : () -> ()
    %cst_23 = arith.constant dense<0.000000e+00> : vector<4x8x8xf32>
    %35 = tpu.matmul %28, %31, %cst_23 {dimension_numbers = #tpu.dot_dimension_numbers<[2], [2], [1], [1], [0, 0, 0, 1, 1, 1], [0], [0]>} : vector<4x8x8xbf16>, vector<4x8x8xbf16>, vector<4x8x8xf32> -> vector<4x8x8xf32>
    "tpu.trace_stop"() : () -> ()
    %cst_24 = arith.constant dense<0xFF800000> : vector<4x8xf32>
    %36 = vector.multi_reduction <maximumf>, %35, %cst_24 [2] : vector<4x8x8xf32> to vector<4x8xf32>
    %37 = vector.shape_cast %36 : vector<4x8xf32> to vector<4x8x1xf32>
    %38 = vector.broadcast %37 : vector<4x8x1xf32> to vector<4x8x8xf32>
    %39 = arith.subf %35, %38 : vector<4x8x8xf32>
    %40 = math.exp %39 : vector<4x8x8xf32>
    %cst_25 = arith.constant dense<0.000000e+00> : vector<4x8xf32>
    %41 = vector.multi_reduction <add>, %40, %cst_25 [2] : vector<4x8x8xf32> to vector<4x8xf32>
    %42 = vector.shape_cast %41 : vector<4x8xf32> to vector<4x8x1xf32>
    %43 = tpu.reciprocal %42 {approx = true} : vector<4x8x1xf32> -> vector<4x8x1xf32>
    %44 = vector.broadcast %43 : vector<4x8x1xf32> to vector<4x8x8xf32>
    %45 = arith.mulf %40, %44 : vector<4x8x8xf32>
    %46 = arith.truncf %45 : vector<4x8x8xf32> to vector<4x8x8xbf16>
    "tpu.trace_start"() <{level = 10 : i32, message = "hqk,hkd->hqd"}> : () -> ()
    %cst_26 = arith.constant dense<0.000000e+00> : vector<4x8x8xf32>
    %47 = tpu.matmul %46, %34, %cst_26 {dimension_numbers = #tpu.dot_dimension_numbers<[2], [1], [1], [2], [0, 0, 0, 1, 1, 2], [0], [0]>} : vector<4x8x8xbf16>, vector<4x8x8xbf16>, vector<4x8x8xf32> -> vector<4x8x8xf32>
    "tpu.trace_stop"() : () -> ()
    %48 = tpu.transpose %47, [1, 0, 2] : vector<4x8x8xf32> -> vector<8x4x8xf32>
    %49 = vector.shape_cast %48 : vector<8x4x8xf32> to vector<8x32xf32>
    %50 = arith.truncf %49 : vector<8x32xf32> to vector<8x32xbf16>
    %c0_27 = arith.constant 0 : index
    %c0_28 = arith.constant 0 : index
    %51 = vector.load %arg11[%c0_27, %c0_28] : memref<32x32xbf16, #tpu.memory_space<vmem>>, vector<32x32xbf16>
    %cst_29 = arith.constant dense<0.000000e+00> : vector<8x32xf32>
    %52 = tpu.matmul %50, %51, %cst_29 {dimension_numbers = #tpu.dot_dimension_numbers<[1], [0], [0], [1], [0, 0, 1, 1], [], []>} : vector<8x32xbf16>, vector<32x32xbf16>, vector<8x32xf32> -> vector<8x32xf32>
    %c0_30 = arith.constant 0 : index
    %c0_31 = arith.constant 0 : index
    %53 = vector.load %arg12[%c0_30, %c0_31] : memref<1x32xf32, #tpu.memory_space<vmem>>, vector<1x32xf32>
    %54 = vector.broadcast %53 : vector<1x32xf32> to vector<8x32xf32>
    %55 = arith.addf %52, %54 : vector<8x32xf32>
    %56 = arith.addf %1, %55 : vector<8x32xf32>
    %cst_32 = arith.constant dense<0.000000e+00> : vector<8xf32>
    %57 = vector.multi_reduction <add>, %56, %cst_32 [1] : vector<8x32xf32> to vector<8xf32>
    %58 = vector.shape_cast %57 : vector<8xf32> to vector<8x1xf32>
    %cst_33 = arith.constant 3.200000e+01 : f32
    %59 = vector.broadcast %cst_33 : f32 to vector<8x1xf32>
    %60 = arith.divf %58, %59 : vector<8x1xf32>
    %61 = vector.broadcast %60 : vector<8x1xf32> to vector<8x32xf32>
    %62 = arith.subf %56, %61 : vector<8x32xf32>
    %63 = arith.mulf %62, %62 : vector<8x32xf32>
    %cst_34 = arith.constant dense<0.000000e+00> : vector<8xf32>
    %64 = vector.multi_reduction <add>, %63, %cst_34 [1] : vector<8x32xf32> to vector<8xf32>
    %65 = vector.shape_cast %64 : vector<8xf32> to vector<8x1xf32>
    %cst_35 = arith.constant 3.200000e+01 : f32
    %66 = vector.broadcast %cst_35 : f32 to vector<8x1xf32>
    %67 = arith.divf %65, %66 : vector<8x1xf32>
    %cst_36 = arith.constant 9.99999974E-6 : f32
    %68 = vector.broadcast %cst_36 : f32 to vector<8x1xf32>
    %69 = arith.addf %67, %68 : vector<8x1xf32>
    %70 = math.rsqrt %69 : vector<8x1xf32>
    %71 = vector.broadcast %70 : vector<8x1xf32> to vector<8x32xf32>
    %72 = arith.mulf %62, %71 : vector<8x32xf32>
    %c0_37 = arith.constant 0 : index
    %c0_38 = arith.constant 0 : index
    %73 = vector.load %arg13[%c0_37, %c0_38] : memref<1x32xf32, #tpu.memory_space<vmem>>, vector<1x32xf32>
    %74 = vector.broadcast %73 : vector<1x32xf32> to vector<8x32xf32>
    %75 = arith.mulf %72, %74 : vector<8x32xf32>
    %c0_39 = arith.constant 0 : index
    %c0_40 = arith.constant 0 : index
    %76 = vector.load %arg14[%c0_39, %c0_40] : memref<1x32xf32, #tpu.memory_space<vmem>>, vector<1x32xf32>
    %77 = vector.broadcast %76 : vector<1x32xf32> to vector<8x32xf32>
    %78 = arith.addf %75, %77 : vector<8x32xf32>
    %c0_41 = arith.constant 0 : index
    %c0_42 = arith.constant 0 : index
    %c0_43 = arith.constant 0 : index
    %79 = vector.load %arg15[%c0_41, %c0_42, %c0_43] : memref<1x8x32xf32, #tpu.memory_space<vmem>>, vector<1x8x32xf32>
    %80 = vector.shape_cast %79 : vector<1x8x32xf32> to vector<8x32xf32>
    %81 = vector.shape_cast %78 : vector<8x32xf32> to vector<1x8x32xf32>
    tpu.vector_store %arg15[%c0_41, %c0_42, %c0_43], %81 {strides = array<i32>} : memref<1x8x32xf32, #tpu.memory_space<vmem>>, vector<1x8x32xf32>,
    return
  }
  func.func @transform_0(%arg0: i32, %arg1: i32) -> (i32, i32, i32) {
    %c0_i32 = arith.constant 0 : i32
    %c0_i32_0 = arith.constant 0 : i32
    return %arg0, %arg1, %c0_i32 : i32, i32, i32
  }
  func.func @transform_1(%arg0: i32, %arg1: i32) -> (i32, i32, i32) {
    %c0_i32 = arith.constant 0 : i32
    %c0_i32_0 = arith.constant 0 : i32
    %c0_i32_1 = arith.constant 0 : i32
    return %arg0, %c0_i32, %c0_i32_0 : i32, i32, i32
  }
  func.func @transform_2(%arg0: i32, %arg1: i32) -> (i32, i32, i32) {
    %c0_i32 = arith.constant 0 : i32
    %c0_i32_0 = arith.constant 0 : i32
    %c0_i32_1 = arith.constant 0 : i32
    return %arg0, %c0_i32, %c0_i32_0 : i32, i32, i32
  }
  func.func @transform_3(%arg0: i32, %arg1: i32) -> (i32, i32) {
    %c0_i32 = arith.constant 0 : i32
    %c0_i32_0 = arith.constant 0 : i32
    %c0_i32_1 = arith.constant 0 : i32
    return %c0_i32, %c0_i32_0 : i32, i32
  }
  func.func @transform_4(%arg0: i32, %arg1: i32) -> (i32, i32) {
    %c0_i32 = arith.constant 0 : i32
    %c0_i32_0 = arith.constant 0 : i32
    %c0_i32_1 = arith.constant 0 : i32
    return %c0_i32, %c0_i32_0 : i32, i32
  }
  func.func @transform_5(%arg0: i32, %arg1: i32) -> (i32, i32) {
    %c0_i32 = arith.constant 0 : i32
    %c0_i32_0 = arith.constant 0 : i32
    %c0_i32_1 = arith.constant 0 : i32
    return %c0_i32, %c0_i32_0 : i32, i32
  }
  func.func @transform_6(%arg0: i32, %arg1: i32) -> (i32, i32) {
    %c0_i32 = arith.constant 0 : i32
    %c0_i32_0 = arith.constant 0 : i32
    %c0_i32_1 = arith.constant 0 : i32
    return %c0_i32, %c0_i32_0 : i32, i32
  }
  func.func @transform_7(%arg0: i32, %arg1: i32) -> (i32, i32) {
    %c0_i32 = arith.constant 0 : i32
    %c0_i32_0 = arith.constant 0 : i32
    %c0_i32_1 = arith.constant 0 : i32
    return %c0_i32, %c0_i32_0 : i32, i32
  }
  func.func @transform_8(%arg0: i32, %arg1: i32) -> (i32, i32) {
    %c0_i32 = arith.constant 0 : i32
    %c0_i32_0 = arith.constant 0 : i32
    %c0_i32_1 = arith.constant 0 : i32
    return %c0_i32, %c0_i32_0 : i32, i32
  }
  func.func @transform_9(%arg0: i32, %arg1: i32) -> (i32, i32) {
    %c0_i32 = arith.constant 0 : i32
    %c0_i32_0 = arith.constant 0 : i32
    %c0_i32_1 = arith.constant 0 : i32
    return %c0_i32, %c0_i32_0 : i32, i32
  }
  func.func @transform_10(%arg0: i32, %arg1: i32) -> (i32, i32) {
    %c0_i32 = arith.constant 0 : i32
    %c0_i32_0 = arith.constant 0 : i32
    %c0_i32_1 = arith.constant 0 : i32
    return %c0_i32, %c0_i32_0 : i32, i32
  }
  func.func @transform_11(%arg0: i32, %arg1: i32) -> (i32, i32) {
    %c0_i32 = arith.constant 0 : i32
    %c0_i32_0 = arith.constant 0 : i32
    %c0_i32_1 = arith.constant 0 : i32
    return %c0_i32, %c0_i32_0 : i32, i32
  }
  func.func @transform_12(%arg0: i32, %arg1: i32) -> (i32, i32) {
    %c0_i32 = arith.constant 0 : i32
    %c0_i32_0 = arith.constant 0 : i32
    %c0_i32_1 = arith.constant 0 : i32
    return %c0_i32, %c0_i32_0 : i32, i32
  }
  func.func @transform_13(%arg0: i32, %arg1: i32) -> (i32, i32, i32) {
    %c0_i32 = arith.constant 0 : i32
    %c0_i32_0 = arith.constant 0 : i32
    return %arg0, %arg1, %c0_i32 : i32, i32, i32
  }
}

</mosaic_0001>

<bundles_post_ra>
// kernel: tpu_custom_call.1
= control target key start
LH: loop header
LB: loop body
LE: loop exit
PB: predicated region body
PF: predicated region fallthrough
CT: control target
= control target key end

     0   :  { %s3283_s0 = inlined_call_operand.hbm [shape: f32[2,8,32], index: 0, kind: input, shape index: {}]   ;;  %s3284_s1 = inlined_call_operand.hbm [shape: f32[2,8,32], index: 1, kind: input, shape index: {}]   ;;  %s3285_s2 = inlined_call_operand.hbm [shape: f32[2,8,32], index: 2, kind: input, shape index: {}]   ;;  %s3286_s3 = inlined_call_operand.hbm [shape: bf16[32,32], index: 3, kind: input, shape index: {}]   ;;  %s3287_s4 = inlined_call_operand.vmem [shape: f32[1,32], index: 4, kind: input, shape index: {}]   ;;  %s3288_s5 = inlined_call_operand.vmem [shape: bf16[32,32], index: 5, kind: input, shape index: {}]   ;;  %s3289_s6 = inlined_call_operand.vmem [shape: f32[1,32], index: 6, kind: input, shape index: {}]   ;;  %s3290_s7 = inlined_call_operand.hbm [shape: bf16[32,32], index: 7, kind: input, shape index: {}]   ;;  %s3291_s8 = inlined_call_operand.hbm [shape: f32[1,32], index: 8, kind: input, shape index: {}]   ;;  %s3292_s9 = inlined_call_operand.vmem [shape: bf16[32,32], index: 9, kind: input, shape index: {}]   ;;  %s3293_s10 = inlined_call_operand.vmem [shape: f32[1,32], index: 10, kind: input, shape index: {}]   ;;  %s3294_s11 = inlined_call_operand.vmem [shape: f32[1,32], index: 11, kind: input, shape index: {}]   ;;  %s3295_s12 = inlined_call_operand.vmem [shape: f32[1,32], index: 12, kind: input, shape index: {}]   ;;  %s3296_s13 = inlined_call_operand.hbm [shape: f32[2,8,32], index: 13, kind: output, shape index: {}]  }
   0x1   :  { %3322 = sst [smem:[#allocation27_spill]] %s3284_s1 }
   0x2   :  { %3323 = sst [smem:[#allocation28_spill]] %s3286_s3 }
   0x3   :  { %3324 = sst [smem:[#allocation29_spill]] %s3287_s4 }
   0x4   :  { %3325 = sst [smem:[#allocation30_spill]] %s3289_s6 }
   0x5   :  { %3326 = sst [smem:[#allocation31_spill]] %s3292_s9 }
   0x6   :  { %3327 = sst [smem:[#allocation32_spill]] %s3293_s10 }
   0x7   :  { %3328 = sst [smem:[#allocation33_spill]] %s3294_s11 }
   0x8   :  { %3329 = sst [smem:[#allocation34_spill]] %s3295_s12 }
   0x9   :  { %3330 = sst [smem:[#allocation35_spill]] %s3296_s13 }
   0xa   :  { %18 = vsyncpa [#allocation3], 0 }
   0xb   :  { %20 = vsyncpa [#allocation3 + $0x1], 0 }
   0xc   :  { %21 = vsyncpa [#allocation6], 0 }
   0xd   :  { %23 = vsyncpa [#allocation6 + $0x1], 0 }
   0xe   :  { %24 = vsyncpa [#allocation9], 0 }
   0xf   :  { %25 = vsyncpa [#allocation12], 0 }
  0x10   :  { %26 = vsyncpa [#allocation4], 0 }
  0x11   :  { %28 = vsyncpa [#allocation4 + $0x1], 0  ;;  %s2747_s25 = smov 0   ;;  %s2749_s26 = smov 0  }
  0x12   :  { %s2751_s27 = smov 0   ;;  %s2753_s28 = smov 0  }
  0x13   :  { %s2755_s29 = smov 0   ;;  %s2757_s30 = smov 0  }
  0x14 LB: > { %3331 = sst [smem:[#allocation19_spill]] %s2636_s25  ;;  %s2778_s14 = sadd.s32 4294967295, %s2656_s30   ;;  %s2656_s30 = sphi %s2757_s30, %s34_s30   ;;  %s2652_s29 = sphi %s2755_s29, %s3382_s29   ;;  %s2648_s28 = sphi %s2753_s28, %s3381_s28   ;;  %s2644_s27 = sphi %s2751_s27, %s3385_s27   ;;  %s2640_s26 = sphi %s2749_s26, %s3384_s26   ;;  %s2636_s25 = sphi %s2747_s25, %s3383_s25  }
  0x15   : > { %3332 = sst [smem:[#allocation20_spill]] %s2648_s28  ;;  %s2081_s15 = sadd.s32 4294967294, %s2656_s30  }
  0x16   : > { %3333 = sst [smem:[#allocation21_spill]] %s2652_s29  ;;  %p68_p0 = scmp.ne.s32.totalorder %s2640_s26, %s2636_s25 }
  0x17   : > { %3334 = sst [smem:[#allocation22_spill]] %s2656_s30  ;;  %p3300_p1 = scmp.eq.s32.totalorder %s2778_s14, 0 }
  0x18   : > { %p362_p3 = scmp.eq.s32.totalorder %s2081_s15, 1  ;;  %p2082_p5 = scmp.ge.s32.totalorder %s2656_s30, 1 }
  0x19   : > { %p2787_p4 = por %p3300_p1, %p68_p0  ;;  %p369_p7 = scmp.lt.s32.totalorder %s2656_s30, 3 }
  0x1a   : > { %p2792_p6 = por %p362_p3, %p68_p0  ;;  %s2658_s19 = smov [#allocation8]  }
  0x1b   : > { %s3335_s16 = scalar_select %p2787_p4, 1, 0 }
  0x1c   : > { %s3336_s17 = scalar_select %p2792_p6, 1, 0 }
  0x1d   : > { %p2797_p8 = pnand %p2082_p5, %p369_p7  ;;  %s381_s20 = sshll.u32 %s2658_s19, 4  ;;  %s382_s20 = int_to_ptr.vmem [resolvable:$true] %s381_s20 }
  0x1e   : > { %3337 = sst [smem:[#allocation23_spill]] %s3336_s17  ;;  %s46_s22 = sadd.s32 1, %s2652_s29 }
  0x1f   : > { %s3338_s18 = scalar_select %p2797_p8, 1, 0 }
  0x20   : > { %p2267_p9 = pneg %p2797_p8  ;;  %s3340_s3 = sld [smem:[#allocation28_spill]] }
  0x22   : > { %p2806_p11 = pnand %p2267_p9, %p3300_p1 }
  0x24   : > { %s3339_s21 = scalar_select %p2806_p11, 1, 0 }
  0x25   : > { %p2819_p13 = pneg %p2806_p11 }
  0x26   : > { %s2388_s15 = scalar_lea.hbm %s3340_s3, 256 }
  0x27   : > { %p2389_p12 = scmp.ne.s32.totalorder %s3340_s3, %s2388_s15  ;;  %p2395_p5 = scmp.lt.u32.totalorder %s2388_s15, %s3340_s3 }
  0x28   : > { %s3341_s19 = scalar_select %p2819_p13, 1, 0 }
  0x29   : > { %p2391_p0 = pnand %p2819_p13, %p2389_p12 }
  0x2b   : > { %p2392_p3 = pneg %p2391_p0 }
  0x2d   : > { %p2397_p7 = pnand %p2395_p5, %p2392_p3 }
  0x2f   : > { %2400 = shalt.err (!%p2397_p7)
}
  0x30   : > { %s2401_s23 = scalar_lea.vmem %s382_s20, 256  ;;  %p2409_p2 = scmp.lt.s32.totalorder %s382_s20, %s382_s20 }
  0x31   : > { %p2402_p9 = scmp.ne.s32.totalorder %s382_s20, %s2401_s23  ;;  %p2410_p6 = scmp.lt.s32.totalorder %s2401_s23, %s2401_s23 }
  0x33   : > { %p2404_p10 = pnand %p2402_p9, %p2819_p13  ;;  %p2411_p4 = por %p2410_p6, %p2409_p2 }
  0x35   : > { %p2405_p1 = pneg %p2404_p10 }
  0x37   : > { %p2412_p8 = pnand %p2411_p4, %p2405_p1 }
  0x39   : > { %2415 = shalt.err (!%p2412_p8)
}
  0x3a   : > { %s3303_s25 = smov 64   ;;  %s3304_s12 = smov 4  }
  0x3b   : > { %2270 = dma.hbm_to_vmem [thread:$0]  (!%p2806_p11), %s3340_s3, 256, %s382_s20, [#allocation9], %s3303_s25, %s3303_s25, %s3304_s12  }
  0x3c   : > { %p48_p1 = scmp.ge.s32.totalorder %s46_s22, 2  ;;  %s55_s24 = sadd.s32 1, %s2644_s27 }
  0x3d   : > { %p62_p2 = scmp.ne.s32.totalorder %s2644_s27, %s2640_s26  ;;  %p63_p4 = scmp.eq.s32.totalorder %s2656_s30, 0 }
  0x3e   : > { %s3387_s22 = smov (%p48_p1, %s46_s22), 0  ;;  %p3343_p8 = scmp.eq.s32.totalorder %s2778_s14, 1 }
  0x3f   : > { %3342 = sst [smem:[#allocation24_spill]] %s3387_s22  ;;  %p64_p6 = por %p63_p4, %p62_p2 }
  0x40   : > { %p2846_p10 = por %p3343_p8, %p62_p2  ;;  %s50_s23 = ssub.s32 %s2652_s29, %s3387_s22 }
  0x41   : > { %p2294_p12 = scmp.lt.s32.totalorder %s2656_s30, 2  ;;  %p53_p0 = scmp.eq.s32.totalorder %s50_s23, 0 }
  0x42   : > { %s3344_s15 = scalar_select %p2846_p10, 1, 0 }
  0x43   : > { %s3306_s11 = sand.u32 1, %s2644_s27   ;;  %s2859_s13 = sshll.u32 %s2652_s29, 7 }
  0x44   : > { %3345 = sst [smem:[#allocation25_spill]] %s3344_s15  ;;  %s2856_s20 = sshll.u32 %s3306_s11, 3 }
  0x45   : > { %s2862_s17 = scalar_select %p53_p0, %s2644_s27, %s55_s24  }
  0x46   : > { %p2864_p3 = pnand %p2294_p12, %p64_p6  ;;  %s459_s12 = sand.u32 1, %s2656_s30  }
  0x47   : > { %3346 = sst [smem:[#allocation26_spill]] %s2862_s17  ;;  %s3348_s1 = sld [smem:[#allocation27_spill]] }
  0x48   : > { %s3347_s25 = scalar_select %p2864_p3, 1, 0 }
  0x49   : > { %s463_s11 = scalar_lea.vmem [#allocation5], %s2856_s20  ;;  %s2661_s24 = smov [#allocation10]  }
  0x4a   : > { %s470_s29 = sshll.u32 %s463_s11, 4  ;;  %s2878_s17 = sshll.u32 %s2661_s24, 4  ;;  %s2876_s29 = int_to_ptr.vmem [resolvable:$true] %s470_s29  ;;  %s404_s17 = int_to_ptr.vmem [resolvable:$true] %s2878_s17 }
  0x4b   : > { %s2880_s15 = scalar_lea.sflag [#allocation6], %s459_s12  ;;  %p2886_p7 = pneg %p2864_p3 }
  0x4d   : > { %s2873_s23 = scalar_lea.hbm %s3348_s1, %s2859_s13  ;;  %s2421_s30 = scalar_lea.hbm %s3348_s1, 256 }
  0x4e   : > { %s2416_s28 = scalar_lea.hbm %s2873_s23, 128  ;;  %p2422_p2 = scmp.lt.u32.totalorder %s2873_s23, %s3348_s1 }
  0x4f   : > { %p2417_p5 = scmp.ne.s32.totalorder %s2873_s23, %s2416_s28  ;;  %p2423_p4 = scmp.lt.u32.totalorder %s2421_s30, %s2416_s28 }
  0x50   : > { %s3349_s3 = scalar_select %p2886_p7, 1, 0 }
  0x51   : > { %p2419_p9 = pnand %p2886_p7, %p2417_p5  ;;  %p2424_p6 = por %p2423_p4, %p2422_p2 }
  0x52   : > { %p2425_p8 = scmp.lt.u32.totalorder %s2416_s28, %s2873_s23 }
  0x53   : > { %p2420_p1 = pneg %p2419_p9 }
  0x54   : > { %p2426_p12 = por %p2425_p8, %p2424_p6 }
  0x56   : > { %p2427_p0 = pnand %p2426_p12, %p2420_p1 }
  0x58   : > { %2430 = shalt.err (!%p2427_p0)
}
  0x59   : > { %s2431_s12 = scalar_lea.vmem %s2876_s29, 128  ;;  %s2662_s22 = smov [#allocation5]  }
  0x5a   : > { %p2432_p5 = scmp.ne.s32.totalorder %s2876_s29, %s2431_s12  ;;  %s2436_s11 = sshll.u32 %s2662_s22, 4  ;;  %s2437_s11 = int_to_ptr.vmem [resolvable:$false] %s2436_s11 }
  0x5b   : > { %s2438_s10 = scalar_lea.vmem %s2437_s11, 256  ;;  %p2439_p11 = scmp.lt.s32.totalorder %s2876_s29, %s2437_s11 }
  0x5c   : > { %p2434_p9 = pnand %p2432_p5, %p2886_p7  ;;  %p2440_p13 = scmp.lt.s32.totalorder %s2438_s10, %s2431_s12 }
  0x5e   : > { %p2435_p10 = pneg %p2434_p9  ;;  %p2441_p2 = por %p2440_p13, %p2439_p11 }
  0x60   : > { %p2442_p4 = pnand %p2441_p2, %p2435_p10 }
  0x62   : > { %2445 = shalt.err (!%p2442_p4)
}
  0x63   : > { %2283 = dma.hbm_to_vmem [thread:$0]  (!%p2864_p3), %s2873_s23, 128, %s2876_s29, %s2880_s15  }
  0x64   : > { %s2446_s24 = scalar_lea.hbm %s3290_s7, 256  ;;  %p3350_p11 = scmp.ne.s32.totalorder %s3341_s19, 0 }
  0x65   : > { %p2447_p1 = scmp.ne.s32.totalorder %s3290_s7, %s2446_s24  ;;  %p2453_p6 = scmp.lt.u32.totalorder %s2446_s24, %s3290_s7 }
  0x67   : > { %p2449_p13 = pnand %p2447_p1, %p3350_p11 }
  0x69   : > { %p2450_p10 = pneg %p2449_p13 }
  0x6b   : > { %p2455_p8 = pnand %p2453_p6, %p2450_p10 }
  0x6d   : > { %2458 = shalt.err (!%p2455_p8)
}
  0x6e   : > { %s2459_s10 = scalar_lea.vmem %s404_s17, 256  ;;  %p2467_p9 = scmp.lt.s32.totalorder %s404_s17, %s404_s17 }
  0x6f   : > { %p2460_p12 = scmp.ne.s32.totalorder %s404_s17, %s2459_s10  ;;  %p2468_p2 = scmp.lt.s32.totalorder %s2459_s10, %s2459_s10 }
  0x71   : > { %p2462_p0 = pnand %p2460_p12, %p3350_p11  ;;  %p2469_p4 = por %p2468_p2, %p2467_p9 }
  0x73   : > { %p2463_p5 = pneg %p2462_p0 }
  0x75   : > { %p2470_p3 = pnand %p2469_p4, %p2463_p5 }
  0x77   : > { %2473 = shalt.err (!%p2470_p3)
}
  0x78   : > { %p3351_p1 = scmp.ne.s32.totalorder %s3339_s21, 0  ;;  %s3352_s1 = smov 4  }
  0x79   : > { %s3353_s29 = smov 64   ;;  %s2663_s30 = smov [#allocation11]  }
  0x7a   : > { %2273 = dma.hbm_to_vmem [thread:$0]  (!%p3351_p1), %s3290_s7, 256, %s404_s17, [#allocation9], %s3353_s29, %s3353_s29, %s3352_s1  }
  0x7b   : > { %s417_s24 = sshll.u32 %s2663_s30, 4  ;;  %s2474_s11 = scalar_lea.hbm %s3291_s8, 16  ;;  %s418_s24 = int_to_ptr.vmem [resolvable:$true] %s417_s24 }
  0x7c   : > { %p2475_p3 = scmp.ne.s32.totalorder %s3291_s8, %s2474_s11  ;;  %p2481_p6 = scmp.lt.u32.totalorder %s2474_s11, %s3291_s8 }
  0x7e   : > { %p2477_p13 = pnand %p2475_p3, %p3350_p11 }
  0x80   : > { %p2478_p10 = pneg %p2477_p13 }
  0x82   : > { %p2483_p8 = pnand %p2481_p6, %p2478_p10 }
  0x84   : > { %2486 = shalt.err (!%p2483_p8)
}
  0x85   : > { %s2487_s17 = scalar_lea.vmem %s418_s24, 16  ;;  %s2494_s1 = scalar_lea.vmem %s418_s24, 32 }
  0x86   : > { %p2488_p12 = scmp.ne.s32.totalorder %s418_s24, %s2487_s17  ;;  %p2495_p9 = scmp.lt.s32.totalorder %s418_s24, %s418_s24 }
  0x87   : > { %p2496_p2 = scmp.lt.s32.totalorder %s2494_s1, %s2487_s17 }
  0x88   : > { %p2490_p0 = pnand %p2488_p12, %p3350_p11 }
  0x89   : > { %p2497_p4 = por %p2496_p2, %p2495_p9 }
  0x8a   : > { %p2491_p5 = pneg %p2490_p0 }
  0x8c   : > { %p2498_p7 = pnand %p2497_p4, %p2491_p5 }
  0x8e   : > { %2501 = shalt.err (!%p2498_p7)
}
  0x8f   : > { %2276 = dma.hbm_to_vmem [thread:$0]  (!%p3351_p1), %s3291_s8, 16, %s418_s24, [#allocation12]  }
  0x90   : > { %s2954_s19 = scalar_lea.hbm %s3283_s0, %s2859_s13  ;;  %s444_s23 = scalar_lea.vmem [#allocation2], %s2856_s20 }
  0x91   : > { %s452_s28 = sshll.u32 %s444_s23, 4  ;;  %s3354_s21 = sand.u32 1, %s2644_s27   ;;  %s453_s28 = int_to_ptr.vmem [resolvable:$true] %s452_s28 }
  0x92   : > { %s441_s30 = scalar_lea.sflag [#allocation3], %s3354_s21  ;;  %s2502_s22 = scalar_lea.hbm %s2954_s19, 128 }
  0x93   : > { %p2503_p7 = scmp.ne.s32.totalorder %s2954_s19, %s2502_s22  ;;  %p3355_p11 = scmp.ne.s32.totalorder %s3349_s3, 0 }
  0x94   : > { %s2507_s11 = scalar_lea.hbm %s3283_s0, 256  ;;  %p2508_p1 = scmp.lt.u32.totalorder %s2954_s19, %s3283_s0 }
  0x95   : > { %p2505_p3 = pnand %p2503_p7, %p3355_p11  ;;  %p2509_p10 = scmp.lt.u32.totalorder %s2507_s11, %s2502_s22 }
  0x96   : > { %p2511_p8 = scmp.lt.u32.totalorder %s2502_s22, %s2954_s19 }
  0x97   : > { %p2506_p13 = pneg %p2505_p3  ;;  %p2510_p6 = por %p2509_p10, %p2508_p1 }
  0x99   : > { %p2512_p12 = por %p2511_p8, %p2510_p6 }
  0x9b   : > { %p2513_p0 = pnand %p2512_p12, %p2506_p13 }
  0x9d   : > { %2516 = shalt.err (!%p2513_p0)
}
  0x9e   : > { %s2517_s1 = scalar_lea.vmem %s453_s28, 128  ;;  %s2664_s9 = smov [#allocation2]  }
  0x9f   : > { %p2518_p5 = scmp.ne.s32.totalorder %s453_s28, %s2517_s1  ;;  %s2522_s29 = sshll.u32 %s2664_s9, 4  ;;  %s2523_s29 = int_to_ptr.vmem [resolvable:$false] %s2522_s29 }
  0xa0   : > { %s2524_s4 = scalar_lea.vmem %s2523_s29, 256  ;;  %p2525_p4 = scmp.lt.s32.totalorder %s453_s28, %s2523_s29 }
  0xa1   : > { %p2520_p9 = pnand %p2518_p5, %p3355_p11  ;;  %p2526_p7 = scmp.lt.s32.totalorder %s2524_s4, %s2517_s1 }
  0xa3   : > { %p2521_p2 = pneg %p2520_p9  ;;  %p2527_p3 = por %p2526_p7, %p2525_p4 }
  0xa5   : > { %p2528_p1 = pnand %p2527_p3, %p2521_p2 }
  0xa7   : > { %2531 = shalt.err (!%p2528_p1)
}
  0xa8   : > { %p3356_p10 = scmp.ne.s32.totalorder %s3347_s25, 0  ;;  %s2980_s21 = scalar_lea.hbm %s3285_s2, %s2859_s13 }
  0xa9   : > { %s481_s22 = scalar_lea.vmem [#allocation7], %s2856_s20  ;;  %s2532_s12 = scalar_lea.hbm %s2980_s21, 128 }
  0xaa   : > { %2280 = dma.hbm_to_vmem [thread:$0]  (!%p3356_p10), %s2954_s19, 128, %s453_s28, %s441_s30  }
  0xab   : > { %s488_s24 = sshll.u32 %s481_s22, 4  ;;  %p2533_p13 = scmp.ne.s32.totalorder %s2980_s21, %s2532_s12  ;;  %s489_s24 = int_to_ptr.vmem [resolvable:$true] %s488_s24 }
  0xac   : > { %s2537_s19 = scalar_lea.hbm %s3285_s2, 256  ;;  %p2538_p12 = scmp.lt.u32.totalorder %s2980_s21, %s3285_s2 }
  0xad   : > { %p2535_p6 = pnand %p2533_p13, %p3355_p11  ;;  %p2539_p0 = scmp.lt.u32.totalorder %s2537_s19, %s2532_s12 }
  0xae   : > { %p2541_p9 = scmp.lt.u32.totalorder %s2532_s12, %s2980_s21 }
  0xaf   : > { %p2536_p8 = pneg %p2535_p6  ;;  %p2540_p5 = por %p2539_p0, %p2538_p12 }
  0xb1   : > { %p2542_p2 = por %p2541_p9, %p2540_p5 }
  0xb3   : > { %p2543_p4 = pnand %p2542_p2, %p2536_p8 }
  0xb5   : > { %2546 = shalt.err (!%p2543_p4)
}
  0xb6   : > { %s2547_s20 = scalar_lea.vmem %s489_s24, 128  ;;  %s2665_s13 = smov [#allocation7]  }
  0xb7   : > { %p2548_p7 = scmp.ne.s32.totalorder %s489_s24, %s2547_s20  ;;  %s2552_s17 = sshll.u32 %s2665_s13, 4  ;;  %s2553_s17 = int_to_ptr.vmem [resolvable:$false] %s2552_s17 }
  0xb8   : > { %s2554_s1 = scalar_lea.vmem %s2553_s17, 256  ;;  %p2555_p13 = scmp.lt.s32.totalorder %s489_s24, %s2553_s17 }
  0xb9   : > { %p2550_p3 = pnand %p2548_p7, %p3355_p11  ;;  %p2556_p6 = scmp.lt.s32.totalorder %s2554_s1, %s2547_s20 }
  0xbb   : > { %p2551_p1 = pneg %p2550_p3  ;;  %p2557_p10 = por %p2556_p6, %p2555_p13 }
  0xbd   : > { %p2558_p0 = pnand %p2557_p10, %p2551_p1 }
  0xbf   : > { %2561 = shalt.err (!%p2558_p0)
}
  0xc0   : > { %p3357_p12 = scmp.ne.s32.totalorder %s3347_s25, 0  ;;  %p3358_p8 = scmp.ne.s32.totalorder %s3338_s18, 0 }
  0xc1   : > { %s3004_s3 = sand.u32 (!%p3358_p8), 1, %s2640_s26   ;;  %p3359_p11 = scmp.ne.s32.totalorder (!%p3358_p8), %s3335_s16, 0 }
  0xc2   : > { %2286 = dma.hbm_to_vmem [thread:$0]  (!%p3357_p12), %s2980_s21, 128, %s489_s24, %s2880_s15  }
  0xc3   : > { %497 = sbr.rel (%p3358_p8) target bundleno = 2061 (0x80d), region = 72  ;;  %s3007_s9 = sshll.u32 (!%p3358_p8), %s3004_s3, 3 }
  0xc4   : > { %s500_s29 = scalar_lea.sflag (!%p3358_p8), [#allocation3], %s3004_s3  ;;  %s503_s4 = scalar_lea.vmem (!%p3358_p8), [#allocation2], %s3007_s9 }
  0xca   : > { %2615 = dma.done.wait (%p3359_p11), %s500_s29, 128  }
  0xcb   : > { %2617 = vsyncadd (%p3359_p11), %s500_s29, 4294967168  ;;  %s508_s18 = sand.u32 1, %s2778_s14   ;;  %s512_s15 = scalar_lea.vmem [#allocation5], %s3007_s9 }
  0xcc   : > { %s509_s25 = scalar_lea.sflag [#allocation6], %s508_s18 }
  0xcd   : > { %2619 = dma.done.wait (%p3359_p11), %s509_s25, 256  }
  0xce   : > { %2621 = vsyncadd (%p3359_p11), %s509_s25, 4294967040  ;;  %s521_s6 = scalar_lea.vmem [#allocation7], %s3007_s9  ;;  %p3360_p10 = scmp.eq.s32.totalorder %s2778_s14, 0 }
  0xd0   : > { %2623 = dma.done.wait (%p3360_p10), [#allocation9], 512   ;;  %p3361_p5 = pmov %p3360_p10 }
  0xd2   : > { %2625 = vsyncadd (%p3361_p5), [#allocation9], 4294966784  ;;  %p3362_p9 = pmov %p3361_p5 }
  0xd3   : > { %p3363_p2 = pmov %p3361_p5 }
  0xd4   : > { %2627 = dma.done.wait (%p3362_p9), [#allocation12], 16  }
  0xd5   : > { %2629 = vsyncadd (%p3363_p2), [#allocation12], 4294967280  ;;  %v2666_v0 = vmov 0.0   ;;  %vm2667_vm0 = vmmov 0   ;;  %v2362_v1 = vld [vmem:[%s3288_s5] sm:$0xff]   ;;  %v2363_v2 = vld [vmem:[#allocation8] sm:$0xff]   ;;  %v808_v28 = vlaneseq }
  0xd6   : > { %2175 = vmatprep.subr.bf16.mxu1 %v2666_v0  ;;  %2167 = vmatprep.subr.bf16.mxu0 %v2666_v0  ;;  %v2364_v3 = vld [vmem:[%s3288_s5 + $0x8] sm:$0xff]   ;;  %v2365_v4 = vld [vmem:[#allocation8 + $0x8] sm:$0xff]   ;;  %vm614_vm1 = vcmask 261120   ;;  %s3364_s12 = sld [smem:[#allocation30_spill]]  ;;  %s3365_s19 = sld [smem:[#allocation29_spill]]  ;;  %v2366_v15 = vld [vmem:[#allocation10] sm:$0xff]  }
  0xd7   : > { %2179 = vmatprep.mubr.msk.bf16.mxu1 %vm2667_vm0, %v2666_v0  ;;  %2171 = vmatprep.mubr.msk.bf16.mxu0 %vm2667_vm0, %v2666_v0  ;;  %v588_v5 = vld [vmem:[%s512_s15] sm:$0xff]  ;;  %v3044_v6 = vld [vmem:[%s503_s4] sm:$0xff]  ;;  %s2668_s28 = smov 104   ;;  %s2669_s30 = smov 120   ;;  %v2671_v26 = vmov 1983009808  }
  0xd8   : > { %2176 = vmatpush3.bf16.msra.mxu1 %v2362_v1  ;;  %2168 = vmatpush3.bf16.msra.mxu0 %v2363_v2  ;;  %v658_v7 = vpack.c.bf16 %v588_v5, %v588_v5  ;;  %v590_v8 = vpack.c.bf16 %v3044_v6, %v3044_v6  ;;  %v2367_v23 = vld [vmem:[#allocation10 + $0x8] sm:$0xff]   ;;  %s2670_s20 = smov 112   ;;  %v806_v27 = vunpack.c.l.s4 %v2671_v26  ;;  %v2672_v29 = vmov 1934713408   ;;  %s3366_s1 = sld [smem:[#allocation31_spill]] }
  0xd9   : > { %2177 = vmatprep.subr.bf16.mxu1 %v2666_v0  ;;  %2169 = vmatprep.subr.bf16.mxu0 %v2666_v0  ;;  %v589_v24 = vld [vmem:[%s521_s6] sm:$0xff]  ;;  %v838_v30 = vunpack.c.l.s4 %v2672_v29  ;;  %v809_v32 = vshrl.u32 %v808_v28, 7  ;;  %vm1243_vm2 = vcmask 64512   ;;  %vm1479_vm3 = vcmask 1043456   ;;  %s2673_s18 = smov 16   ;;  %s2674_s25 = smov 8  }
  0xda   : > { %v725_v25 = vpack.c.bf16 %v589_v24, %v589_v24  ;;  %v807_v31 = vunpack.c.0.s8 %v806_v27  ;;  %s2675_s15 = smov 24   ;;  %vm1810_vm4 = vcmask 130048   ;;  %vm1812_vm5 = vcmask 195584   ;;  %s3367_s23 = sld [smem:[#allocation32_spill]] }
  0xdb   : > { %v839_v35 = vunpack.c.0.s8 %v838_v30  ;;  %s3368_s14 = sld [smem:[#allocation20_spill]]  ;;  %s3369_s21 = sld [smem:[#allocation25_spill]] }
  0xdc   : > { %2178 = vmatpush3.bf16.msra.mxu1 %v2364_v3  ;;  %2170 = vmatpush3.bf16.msra.mxu0 %v2365_v4  ;;  %v2105_v9 = vld [vmem:[%s3364_s12] ss:$0 sm:$0xff]  ;;  %v3075_v36 = vsub.s32 %v807_v31, %v809_v32  ;;  %s3370_s12 = sld [smem:[#allocation33_spill]]  ;;  %s3372_s29 = sld [smem:[#allocation35_spill]] }
  0xdd   : > { %2191 = vmatprep.subr.bf16.mxu1 %v2666_v0  ;;  %2183 = vmatprep.subr.bf16.mxu0 %v2666_v0  ;;  %v2101_v10 = vld [vmem:[%s3365_s19] ss:$0 sm:$0xff]  ;;  %v3077_v43 = vsub.s32 %v839_v35, %v809_v32  ;;  %s3371_s19 = sld [smem:[#allocation34_spill]] }
  0xdf   : > { %2180 = vmatmul.mubr.msk.bf16.vlgmr.msra.gmra.mrb[0].mxu1 %vm614_vm1, %v658_v7  ;;  %2172 = vmatmul.mubr.msk.bf16.vlgmr.msra.gmra.mrb[0].mxu0 %vm614_vm1, %v590_v8 }
  0xe0   : > { %2193 = vmatprep.mubr.msk.bf16.mxu1 %vm2667_vm0, %v2666_v0  ;;  %2187 = vmatprep.mubr.msk.bf16.mxu0 %vm2667_vm0, %v2666_v0 }
  0xe1   : > { %2184 = vmatpush3.bf16.msra.mxu0 %v2366_v15  ;;  %p3374_p7 = scmp.ne.s32.totalorder %s3369_s21, 0 }
  0xe2   : > { %2185 = vmatprep.subr.bf16.mxu0 %v2666_v0  ;;  %s3373_s4 = smov %s3372_s29 }
  0xe5   : > { %2186 = vmatpush3.bf16.msra.mxu0 %v2367_v23 }
  0xe6   : > { %2197 = vmatprep.subr.bf16.mxu0 %v2666_v0 }
  0xe8   : > { %2188 = vmatmul.mubr.msk.bf16.vlgmr.msra.gmra.mrb[4].mxu0 %vm614_vm1, %v725_v25 }
  0xe9   : > { %2199 = vmatprep.mubr.msk.bf16.mxu0 %vm2667_vm0, %v2666_v0 }
 0x1b2   : > { %v719_v11 = vpop.f32.mrb[0].mxu1  ;;  %v652_v14 = vpop.f32.mrb[0].mxu0 }
 0x1b3   : > { %v720_v12 = vadd.f32 %v2105_v9, %v719_v11  ;;  %v2181_v13 = vpop.f32.mrb[1].mxu1  ;;  %v653_v16 = vadd.f32 %v2101_v10, %v652_v14  ;;  %v2173_v18 = vpop.f32.mrb[1].mxu0 }
 0x1b4   : > { %v722_v17 = vpop.f32.mrb[2].mxu1  ;;  %v655_v20 = vpop.f32.mrb[2].mxu0 }
 0x1b5   : > { %950 = vrot.lane.b32.xlu1 %v720_v12, %s2668_s28  ;;  %944 = vrot.lane.b32.xlu0 %v720_v12, %s2669_s30  ;;  %v2182_v19 = vpop.f32.mrb[3].mxu1  ;;  %v792_v21 = vmul.f32 0.35355338, %v653_v16  ;;  %v2174_v22 = vpop.f32.mrb[3].mxu0 }
 0x1b9   : > { %947 = vrot.lane.b32.xlu0 %v720_v12, %s2670_s20  ;;  %794 = vrot.lane.b32.xlu1 %v792_v21, %s2669_s30 }
 0x1bd   : > { %797 = vrot.lane.b32.xlu0 %v792_v21, %s2670_s20  ;;  %800 = vrot.lane.b32.xlu1 %v792_v21, %s2668_s28 }
 0x227   : > { %v951_v33 = vpop.permute.xlu1 %950  ;;  %v945_v34 = vpop.permute.xlu0 %944 }
 0x228   : > { %v969_v37 = vcombine.low %v945_v34, %v951_v33  ;;  %v970_v38 = vcombine.high %v945_v34, %v951_v33 }
 0x22a   : > { %v977_v44 = vrot.slane %v969_v37, %v3075_v36  ;;  %v984_v45 = vrot.slane %v970_v38, %v3075_v36 }
 0x22b   : > { %v948_v39 = vpop.permute.xlu0 %947  ;;  %v795_v40 = vpop.permute.xlu1 %794 }
 0x22c   : > { %v953_v41 = vcombine.low %v720_v12, %v948_v39  ;;  %v954_v42 = vcombine.high %v720_v12, %v948_v39 }
 0x22e   : > { %v961_v46 = vrot.slane %v953_v41, %v3075_v36  ;;  %v968_v47 = vrot.slane %v954_v42, %v3075_v36 }
 0x22f   : > { %v798_v48 = vpop.permute.xlu0 %797  ;;  %v801_v49 = vpop.permute.xlu1 %800 }
 0x230   : > { %v985_v50 = vcombine.low %v961_v46, %v977_v44  ;;  %v986_v51 = vcombine.high %v961_v46, %v977_v44  ;;  %v1001_v52 = vcombine.low %v968_v47, %v984_v45  ;;  %v1002_v53 = vcombine.high %v968_v47, %v984_v45 }
 0x231   : > { %v803_v54 = vcombine.low %v792_v21, %v798_v48  ;;  %v804_v55 = vcombine.high %v792_v21, %v798_v48  ;;  %v819_v56 = vcombine.low %v795_v40, %v801_v49  ;;  %v820_v57 = vcombine.high %v795_v40, %v801_v49 }
 0x232   : > { %v993_v58 = vrot.slane %v985_v50, %v3077_v43  ;;  %v1000_v59 = vrot.slane %v986_v51, %v3077_v43  ;;  %v1009_v60 = vrot.slane %v1001_v52, %v3077_v43  ;;  %v1016_v61 = vrot.slane %v1002_v53, %v3077_v43 }
 0x233   : > { %v811_v62 = vrot.slane %v803_v54, %v3075_v36  ;;  %v818_v63 = vrot.slane %v804_v55, %v3075_v36  ;;  %v827_v1 = vrot.slane %v819_v56, %v3075_v36  ;;  %v834_v2 = vrot.slane %v820_v57, %v3075_v36 }
 0x234   : > { %v1021_v3 = vcombine.low %v993_v58, %v1000_v59  ;;  %v2115_v4 = vcombine.high %v993_v58, %v1000_v59  ;;  %v1037_v5 = vcombine.low %v1009_v60, %v1016_v61  ;;  %v2116_v7 = vcombine.high %v1009_v60, %v1016_v61 }
 0x235   : > { %v835_v8 = vcombine.low %v811_v62, %v827_v1  ;;  %v836_v9 = vcombine.high %v811_v62, %v827_v1  ;;  %v851_v10 = vcombine.low %v818_v63, %v834_v2  ;;  %v852_v11 = vcombine.high %v818_v63, %v834_v2 }
 0x236   : > { %v1028_v12 = vrot.slane %v1021_v3, %v3075_v36  ;;  %v1036_v13 = vrot.slane %v2115_v4, %v3075_v36  ;;  %v1044_v14 = vrot.slane %v1037_v5, %v3075_v36  ;;  %v1052_v15 = vrot.slane %v2116_v7, %v3075_v36  ;;  %v786_v3 = vpop.f32.mrb[4].mxu0 }
 0x237   : > { %v843_v16 = vrot.slane %v835_v8, %v3077_v43  ;;  %v850_v17 = vrot.slane %v836_v9, %v3077_v43  ;;  %v859_v18 = vrot.slane %v851_v10, %v3077_v43  ;;  %v866_v19 = vrot.slane %v852_v11, %v3077_v43  ;;  %v2189_v4 = vpop.f32.mrb[5].mxu0 }
 0x238   : > { %v1053_v20 = vcombine.low %v1028_v12, %v1036_v13  ;;  %v1069_v21 = vcombine.low %v1044_v14, %v1052_v15  ;;  %v1054_v22 = vcombine.high %v1028_v12, %v1036_v13  ;;  %v1070_v23 = vcombine.high %v1044_v14, %v1052_v15  ;;  %v789_v5 = vpop.f32.mrb[6].mxu0 }
 0x239   : > { %v871_v24 = vcombine.low %v843_v16, %v850_v17  ;;  %v2113_v25 = vcombine.high %v843_v16, %v850_v17  ;;  %v887_v26 = vcombine.low %v859_v18, %v866_v19  ;;  %v2114_v27 = vcombine.high %v859_v18, %v866_v19  ;;  %v2190_v7 = vpop.f32.mrb[7].mxu0 }
 0x23a   : > { %v1061_v28 = vrot.slane %v1053_v20, %v3077_v43  ;;  %v1077_v29 = vrot.slane %v1069_v21, %v3077_v43  ;;  %v1068_v37 = vrot.slane %v1054_v22, %v3077_v43  ;;  %v1084_v38 = vrot.slane %v1070_v23, %v3077_v43 }
 0x23b   : > { %v878_v30 = vrot.slane %v871_v24, %v3075_v36  ;;  %v886_v31 = vrot.slane %v2113_v25, %v3075_v36  ;;  %v894_v32 = vrot.slane %v887_v26, %v3075_v36  ;;  %v902_v33 = vrot.slane %v2114_v27, %v3075_v36 }
 0x23c   : > { %v1085_v34 = vcombine.low %v1061_v28, %v1077_v29  ;;  %v1086_v35 = vcombine.high %v1061_v28, %v1077_v29  ;;  %v1087_v48 = vcombine.low %v1068_v37, %v1084_v38  ;;  %v1088_v49 = vcombine.high %v1068_v37, %v1084_v38  ;;  %v2109_v28 = vld [vmem:[#allocation11] ss:$0 sm:$0xff] }
 0x23d   : > { %v903_v39 = vcombine.low %v878_v30, %v886_v31  ;;  %v919_v40 = vcombine.low %v894_v32, %v902_v33  ;;  %v904_v50 = vcombine.high %v878_v30, %v886_v31  ;;  %v920_v51 = vcombine.high %v894_v32, %v902_v33 }
 0x23e   : > { %v1089_v41 = vpack.c.bf16 %v1085_v34, %v1085_v34  ;;  %v1090_v42 = vpack.c.bf16 %v1086_v35, %v1086_v35  ;;  %v1091_v54 = vpack.c.bf16 %v1087_v48, %v1087_v48  ;;  %v1092_v55 = vpack.c.bf16 %v1088_v49, %v1088_v49 }
 0x23f   : > { %v911_v44 = vrot.slane %v903_v39, %v3077_v43  ;;  %v927_v45 = vrot.slane %v919_v40, %v3077_v43  ;;  %v918_v58 = vrot.slane %v904_v50, %v3077_v43  ;;  %v934_v59 = vrot.slane %v920_v51, %v3077_v43 }
 0x240   : > { %v1248_v46 = vsel %vm1243_vm2, %v1089_v41, 0  ;;  %v1294_v47 = vsel %vm1243_vm2, %v1090_v42, 0  ;;  %v1340_v60 = vsel %vm1243_vm2, %v1091_v54, 0  ;;  %v1386_v61 = vsel %vm1243_vm2, %v1092_v55, 0 }
 0x241   : > { %2192 = vmatpush3.bf16.xpose.msra.mxu1 %v1248_v46  ;;  %2198 = vmatpush3.bf16.xpose.msra.mxu0 %v1294_v47  ;;  %v935_v52 = vcombine.low %v911_v44, %v927_v45  ;;  %v936_v53 = vcombine.high %v911_v44, %v927_v45  ;;  %v937_v62 = vcombine.low %v918_v58, %v934_v59 }
 0x242   : > { %2203 = vmatprep.subr.bf16.mxu1 %v2666_v0  ;;  %2209 = vmatprep.subr.bf16.mxu0 %v2666_v0  ;;  %v938_v63 = vcombine.high %v918_v58, %v934_v59  ;;  %v787_v29 = vadd.f32 %v2109_v28, %v786_v3 }
 0x243   : > { %v939_v56 = vpack.c.bf16 %v935_v52, %v935_v52  ;;  %v940_v57 = vpack.c.bf16 %v936_v53, %v936_v53  ;;  %v941_v1 = vpack.c.bf16 %v937_v62, %v937_v62 }
 0x244   : > { %v942_v2 = vpack.c.bf16 %v938_v63, %v938_v63 }
 0x248   : > { %2194 = vmatmul.mubr.msk.bf16.vlgmr.msra.gmra.mrb[4].mxu1 %vm1243_vm2, %v939_v56  ;;  %2200 = vmatmul.mubr.msk.bf16.vlgmr.msra.gmra.mrb[8].mxu0 %vm1243_vm2, %v940_v57 }
 0x249   : > { %2204 = vmatpush3.bf16.xpose.msra.mxu1 %v1340_v60  ;;  %2210 = vmatpush3.bf16.xpose.msra.mxu0 %v1386_v61 }
 0x24a   : > { %2205 = vmatprep.mubr.msk.bf16.mxu1 %vm2667_vm0, %v2666_v0  ;;  %2211 = vmatprep.mubr.msk.bf16.mxu0 %vm2667_vm0, %v2666_v0 }
 0x24b   : > { %2215 = vmatprep.subr.bf16.mxu1 %v2666_v0  ;;  %2221 = vmatprep.subr.bf16.mxu0 %v2666_v0 }
 0x250   : > { %2206 = vmatmul.mubr.msk.bf16.vlgmr.msra.gmra.mrb[8].mxu1 %vm1243_vm2, %v941_v1  ;;  %2212 = vmatmul.mubr.msk.bf16.vlgmr.msra.gmra.mrb[12].mxu0 %vm1243_vm2, %v942_v2 }
 0x251   : > { %2217 = vmatprep.mubr.msk.bf16.mxu1 %vm2667_vm0, %v2666_v0  ;;  %2223 = vmatprep.mubr.msk.bf16.mxu0 %vm2667_vm0, %v2666_v0 }
 0x31b   : > { %v1284_v8 = vpop.f32.mrb[4].mxu1  ;;  %v1330_v9 = vpop.f32.mrb[8].mxu0 }
 0x31c   : > { %v2195_v10 = vpop.f32.mrb[5].mxu1  ;;  %v2201_v11 = vpop.f32.mrb[9].mxu0  ;;  %v1428_v12 = vsel %vm1243_vm2, %v1284_v8, -inf  ;;  %v1431_v13 = vsel %vm1243_vm2, %v1330_v9, -inf }
 0x31d   : > { %1429 = vmax.xlane.f32.xlu0 %v1428_v12  ;;  %v1287_v14 = vpop.f32.mrb[6].mxu1  ;;  %1432 = vmax.xlane.f32.xlu1 %v1431_v13  ;;  %v1333_v15 = vpop.f32.mrb[10].mxu0 }
 0x31e   : > { %v2196_v16 = vpop.f32.mrb[7].mxu1  ;;  %v2202_v17 = vpop.f32.mrb[11].mxu0 }
 0x323   : > { %v1376_v18 = vpop.f32.mrb[8].mxu1  ;;  %v1422_v19 = vpop.f32.mrb[12].mxu0 }
 0x324   : > { %v2207_v20 = vpop.f32.mrb[9].mxu1  ;;  %v2213_v21 = vpop.f32.mrb[13].mxu0  ;;  %v1434_v22 = vsel %vm1243_vm2, %v1376_v18, -inf  ;;  %v1437_v27 = vsel %vm1243_vm2, %v1422_v19, -inf }
 0x325   : > { %1435 = vmax.xlane.f32.xlu0 %v1434_v22  ;;  %v1379_v23 = vpop.f32.mrb[10].mxu1  ;;  %v1425_v24 = vpop.f32.mrb[14].mxu0 }
 0x326   : > { %v2208_v25 = vpop.f32.mrb[11].mxu1  ;;  %v2214_v26 = vpop.f32.mrb[15].mxu0 }
 0x329   : > { %1438 = vmax.xlane.f32.xlu0 %v1437_v27 }
 0x32e   : > { %1094 = vrot.lane.b32.xlu1 %v787_v29, %s2669_s30  ;;  %s585_s30 = scalar_lea.vmem [#allocation13], %s3007_s9  ;;  %s2676_s9 = smov [#allocation13]  }
 0x32f   : > { %s2566_s6 = sshll.u32 %s2676_s9, 4  ;;  %s2567_s6 = int_to_ptr.vmem [resolvable:$false] %s2566_s6 }
 0x330   : > { %s2568_s16 = scalar_lea.vmem %s2567_s6, 256 }
 0x3aa   : > { %v1430_v30 = vpop.xlane.xlu0 %1429  ;;  %v1433_v31 = vpop.xlane.xlu1 %1432 }
 0x3ab   : > { %v1440_v32 = vsub.f32 %v1284_v8, %v1430_v30  ;;  %v1441_v33 = vsub.f32 %v1330_v9, %v1433_v31 }
 0x3ad   : > { %v1444_v34 = vmul.f32 1.442695, %v1440_v32  ;;  %v1446_v35 = vmul.f32 1.442695, %v1441_v33 }
 0x3ae   : > { %v1095_v52 = vpop.permute.xlu1 %1094 }
 0x3af   : > { %2370 = vpow2.f32 %v1444_v34 }
 0x3b0   : > { %2372 = vpow2.f32 %v1446_v35 }
 0x3b2   : > { %v1436_v41 = vpop.xlane.xlu0 %1435 }
 0x3b3   : > { %v1442_v44 = vsub.f32 %v1376_v18, %v1436_v41 }
 0x3b5   : > { %v1448_v46 = vmul.f32 1.442695, %v1442_v44 }
 0x3b6   : > { %v1439_v42 = vpop.xlane.xlu0 %1438 }
 0x3b7   : > { %v1443_v45 = vsub.f32 %v1422_v19, %v1439_v42  ;;  %2374 = vpow2.f32 %v1448_v46 }
 0x3b9   : > { %v3136_v37 = vpop.eup %2370  ;;  %v1450_v47 = vmul.f32 1.442695, %v1443_v45 }
 0x3ba   : > { %v3138_v38 = vpop.eup %2372  ;;  %v1452_v39 = vsel %vm1243_vm2, %v3136_v37, 0.0 }
 0x3bb   : > { %1453 = vadd.xlane.f32.xlu1 %v1452_v39  ;;  %v1455_v40 = vsel %vm1243_vm2, %v3138_v38, 0.0  ;;  %2376 = vpow2.f32 %v1450_v47 }
 0x3bc   : > { %1456 = vadd.xlane.f32.xlu0 %v1455_v40 }
 0x3c1   : > { %v3146_v48 = vpop.eup %2374 }
 0x3c2   : > { %v1458_v50 = vsel %vm1243_vm2, %v3146_v48, 0.0 }
 0x3c5   : > { %v3148_v49 = vpop.eup %2376 }
 0x3c6   : > { %v1461_v51 = vsel %vm1243_vm2, %v3148_v49, 0.0 }
 0x3cc   : > { %1100 = vrot.lane.b32.xlu1 %v787_v29, %s2668_s28  ;;  %s2136_s28 = sshll.u32 %s3368_s14, 7 }
 0x3d2   : > { %1097 = vrot.lane.b32.xlu0 %v787_v29, %s2670_s20  ;;  %s1928_s20 = sshll.u32 %s585_s30, 4  ;;  %s3235_s20 = int_to_ptr.vmem [resolvable:$true] %s1928_s20 }
 0x3d3   : > { %p2569_p13 = scmp.lt.s32.totalorder %s3235_s20, %s2567_s6 }
 0x3f0   : > { %1459 = vadd.xlane.f32.xlu1 %v1458_v50 }
 0x3f1   : > { %1462 = vadd.xlane.f32.xlu0 %v1461_v51 }
 0x448   : > { %v1454_v53 = vpop.xlane.xlu1 %1453 }
 0x449   : > { %v1457_v54 = vpop.xlane.xlu0 %1456  ;;  %2378 = vrcp.f32 %v1454_v53 }
 0x44a   : > { %2380 = vrcp.f32 %v1457_v54 }
 0x44c   : > { %v1101_v55 = vpop.permute.xlu1 %1100 }
 0x44d   : > { %v1119_v56 = vcombine.low %v1095_v52, %v1101_v55  ;;  %v1120_v57 = vcombine.high %v1095_v52, %v1101_v55  ;;  %v1098_v58 = vpop.permute.xlu0 %1097 }
 0x44e   : > { %v1103_v59 = vcombine.low %v787_v29, %v1098_v58  ;;  %v1104_v60 = vcombine.high %v787_v29, %v1098_v58 }
 0x44f   : > { %v1127_v61 = vrot.slane %v1119_v56, %v3075_v36  ;;  %v1134_v62 = vrot.slane %v1120_v57, %v3075_v36 }
 0x450   : > { %v1111_v63 = vrot.slane %v1103_v59, %v3075_v36  ;;  %v1118_v1 = vrot.slane %v1104_v60, %v3075_v36 }
 0x452   : > { %v1135_v2 = vcombine.low %v1111_v63, %v1127_v61  ;;  %v1136_v3 = vcombine.high %v1111_v63, %v1127_v61  ;;  %v1151_v4 = vcombine.low %v1118_v1, %v1134_v62  ;;  %v1152_v5 = vcombine.high %v1118_v1, %v1134_v62 }
 0x453   : > { %v2379_v25 = vpop.eup %2378 }
 0x454   : > { %v1143_v7 = vrot.slane %v1135_v2, %v3077_v43  ;;  %v1150_v8 = vrot.slane %v1136_v3, %v3077_v43  ;;  %v1159_v9 = vrot.slane %v1151_v4, %v3077_v43  ;;  %v1166_v10 = vrot.slane %v1152_v5, %v3077_v43  ;;  %v2381_v28 = vpop.eup %2380 }
 0x455   : > { %v1468_v33 = vmul.f32 %v2379_v25, %v3136_v37  ;;  %v1469_v34 = vmul.f32 %v2381_v28, %v3138_v38 }
 0x456   : > { %v1171_v11 = vcombine.low %v1143_v7, %v1150_v8  ;;  %v2117_v12 = vcombine.high %v1143_v7, %v1150_v8  ;;  %v1187_v13 = vcombine.low %v1159_v9, %v1166_v10  ;;  %v2118_v14 = vcombine.high %v1159_v9, %v1166_v10 }
 0x457   : > { %v1472_v45 = vpack.c.bf16 %v1468_v33, %v1468_v33  ;;  %v1473_v46 = vpack.c.bf16 %v1469_v34, %v1469_v34 }
 0x458   : > { %v1178_v15 = vrot.slane %v1171_v11, %v3075_v36  ;;  %v1186_v16 = vrot.slane %v2117_v12, %v3075_v36  ;;  %v1194_v17 = vrot.slane %v1187_v13, %v3075_v36  ;;  %v1202_v18 = vrot.slane %v2118_v14, %v3075_v36 }
 0x45a   : > { %v1203_v19 = vcombine.low %v1178_v15, %v1186_v16  ;;  %v1204_v20 = vcombine.high %v1178_v15, %v1186_v16  ;;  %v1219_v21 = vcombine.low %v1194_v17, %v1202_v18  ;;  %v1220_v22 = vcombine.high %v1194_v17, %v1202_v18 }
 0x45c   : > { %v1211_v23 = vrot.slane %v1203_v19, %v3077_v43  ;;  %v1218_v24 = vrot.slane %v1204_v20, %v3077_v43  ;;  %v1227_v26 = vrot.slane %v1219_v21, %v3077_v43  ;;  %v1234_v27 = vrot.slane %v1220_v22, %v3077_v43  ;;  %v2368_v21 = vld [vmem:[%s3366_s1] sm:$0xff]  }
 0x45e   : > { %v1235_v29 = vcombine.low %v1211_v23, %v1227_v26  ;;  %v1236_v30 = vcombine.high %v1211_v23, %v1227_v26  ;;  %v1237_v31 = vcombine.low %v1218_v24, %v1234_v27  ;;  %v1238_v32 = vcombine.high %v1218_v24, %v1234_v27 }
 0x460   : > { %v1239_v35 = vpack.c.bf16 %v1235_v29, %v1235_v29  ;;  %v1240_v39 = vpack.c.bf16 %v1236_v30, %v1236_v30  ;;  %v1241_v42 = vpack.c.bf16 %v1237_v31, %v1237_v31  ;;  %v1242_v44 = vpack.c.bf16 %v1238_v32, %v1238_v32  ;;  %v2369_v30 = vld [vmem:[%s3366_s1 + $0x8] sm:$0xff]  }
 0x462   : > { %v1481_v40 = vsel %vm1479_vm3, %v1239_v35, 0  ;;  %v1527_v41 = vsel %vm1479_vm3, %v1240_v39, 0  ;;  %v1573_v37 = vsel %vm1479_vm3, %v1241_v42, 0  ;;  %v1619_v38 = vsel %vm1479_vm3, %v1242_v44, 0 }
 0x463   : > { %2216 = vmatpush3.bf16.msra.mxu1 %v1481_v40  ;;  %2222 = vmatpush3.bf16.msra.mxu0 %v1527_v41 }
 0x464   : > { %2227 = vmatprep.subr.bf16.mxu1 %v2666_v0  ;;  %2233 = vmatprep.subr.bf16.mxu0 %v2666_v0 }
 0x466   : > { %2218 = vmatmul.mubr.msk.bf16.vlgmr.msra.gmra.mrb[12].mxu1 %vm1243_vm2, %v1472_v45  ;;  %2224 = vmatmul.mubr.msk.bf16.vlgmr.msra.gmra.mrb[16].mxu0 %vm1243_vm2, %v1473_v46 }
 0x467   : > { %2228 = vmatpush3.bf16.msra.mxu1 %v1573_v37  ;;  %2234 = vmatpush3.bf16.msra.mxu0 %v1619_v38 }
 0x468   : > { %2229 = vmatprep.mubr.msk.bf16.mxu1 %vm2667_vm0, %v2666_v0  ;;  %2235 = vmatprep.mubr.msk.bf16.mxu0 %vm2667_vm0, %v2666_v0 }
 0x469   : > { %2239 = vmatprep.subr.bf16.mxu1 %v2666_v0 }
 0x47d   : > { %v1460_v47 = vpop.xlane.xlu1 %1459 }
 0x47e   : > { %2382 = vrcp.f32 %v1460_v47  ;;  %v1463_v50 = vpop.xlane.xlu0 %1462 }
 0x47f   : > { %2384 = vrcp.f32 %v1463_v50 }
 0x488   : > { %v2383_v51 = vpop.eup %2382 }
 0x489   : > { %v2385_v52 = vpop.eup %2384  ;;  %v1470_v53 = vmul.f32 %v2383_v51, %v3146_v48 }
 0x48a   : > { %v1471_v54 = vmul.f32 %v2385_v52, %v3148_v49 }
 0x48b   : > { %v1474_v55 = vpack.c.bf16 %v1470_v53, %v1470_v53 }
 0x48c   : > { %v1475_v56 = vpack.c.bf16 %v1471_v54, %v1471_v54 }
 0x48d   : > { %2230 = vmatmul.mubr.msk.bf16.vlgmr.msra.gmra.mrb[16].mxu1 %vm1243_vm2, %v1474_v55  ;;  %v2129_v55 = vld [vmem:[%s3367_s23] ss:$0 sm:$0xff] }
 0x48e   : > { %2236 = vmatmul.mubr.msk.bf16.vlgmr.msra.gmra.mrb[20].mxu0 %vm1243_vm2, %v1475_v56  ;;  %2243 = vmatprep.mubr.msk.bf16.mxu1 %vm2667_vm0, %v2666_v0 }
 0x48f   : > { %2240 = vmatpush3.bf16.msra.mxu1 %v2368_v21 }
 0x490   : > { %2241 = vmatprep.subr.bf16.mxu1 %v2666_v0 }
 0x493   : > { %2242 = vmatpush3.bf16.msra.mxu1 %v2369_v30 }
 0x539   : > { %v1517_v57 = vpop.f32.mrb[12].mxu1  ;;  %v1563_v58 = vpop.f32.mrb[16].mxu0 }
 0x53a   : > { %v2219_v59 = vpop.f32.mrb[13].mxu1  ;;  %v2225_v60 = vpop.f32.mrb[17].mxu0 }
 0x53b   : > { %v1520_v61 = vpop.f32.mrb[14].mxu1  ;;  %v1566_v62 = vpop.f32.mrb[18].mxu0 }
 0x53c   : > { %v2220_v63 = vpop.f32.mrb[15].mxu1  ;;  %v2226_v1 = vpop.f32.mrb[19].mxu0 }
 0x560   : > { %v1609_v48 = vpop.f32.mrb[16].mxu1 }
 0x561   : > { %v1661_v2 = vcombine.low %v1517_v57, %v1609_v48  ;;  %v1662_v49 = vcombine.high %v1517_v57, %v1609_v48  ;;  %v1655_v3 = vpop.f32.mrb[20].mxu0  ;;  %v2231_v4 = vpop.f32.mrb[17].mxu1 }
 0x562   : > { %v1677_v5 = vcombine.low %v1563_v58, %v1655_v3  ;;  %v1678_v7 = vcombine.high %v1563_v58, %v1655_v3  ;;  %v2237_v8 = vpop.f32.mrb[21].mxu0  ;;  %v1612_v9 = vpop.f32.mrb[18].mxu1 }
 0x563   : > { %v1669_v10 = vrot.slane %v1661_v2, %v3075_v36  ;;  %v1676_v11 = vrot.slane %v1662_v49, %v3075_v36  ;;  %v1658_v12 = vpop.f32.mrb[22].mxu0  ;;  %v2232_v13 = vpop.f32.mrb[19].mxu1  ;;  %v2134_v9 = vld [vmem:[%s3371_s19] ss:$0 sm:$0xff] }
 0x564   : > { %v1685_v14 = vrot.slane %v1677_v5, %v3075_v36  ;;  %v1692_v15 = vrot.slane %v1678_v7, %v3075_v36  ;;  %v2238_v16 = vpop.f32.mrb[23].mxu0 }
 0x566   : > { %v1693_v17 = vcombine.low %v1669_v10, %v1685_v14  ;;  %v1694_v18 = vcombine.high %v1669_v10, %v1685_v14  ;;  %v1709_v19 = vcombine.low %v1676_v11, %v1692_v15  ;;  %v1710_v20 = vcombine.high %v1676_v11, %v1692_v15 }
 0x568   : > { %v1701_v22 = vrot.slane %v1693_v17, %v3077_v43  ;;  %v1708_v23 = vrot.slane %v1694_v18, %v3077_v43  ;;  %v1717_v24 = vrot.slane %v1709_v19, %v3077_v43  ;;  %v1724_v25 = vrot.slane %v1710_v20, %v3077_v43 }
 0x56a   : > { %v1729_v26 = vcombine.low %v1701_v22, %v1708_v23  ;;  %v2127_v27 = vcombine.high %v1701_v22, %v1708_v23  ;;  %v1745_v28 = vcombine.low %v1717_v24, %v1724_v25  ;;  %v2128_v29 = vcombine.high %v1717_v24, %v1724_v25 }
 0x56c   : > { %v1736_v31 = vrot.slane %v1729_v26, %v3075_v36  ;;  %v1744_v32 = vrot.slane %v2127_v27, %v3075_v36  ;;  %v1752_v33 = vrot.slane %v1745_v28, %v3075_v36  ;;  %v1760_v34 = vrot.slane %v2128_v29, %v3075_v36 }
 0x56e   : > { %v1762_v35 = vcombine.high %v1736_v31, %v1744_v32  ;;  %v1778_v39 = vcombine.high %v1752_v33, %v1760_v34  ;;  %v1761_v0 = vcombine.low %v1736_v31, %v1744_v32  ;;  %v1777_v40 = vcombine.low %v1752_v33, %v1760_v34 }
 0x570   : > { %v1776_v41 = vrot.slane %v1762_v35, %v3077_v43  ;;  %v1792_v42 = vrot.slane %v1778_v39, %v3077_v43  ;;  %v1769_v44 = vrot.slane %v1761_v0, %v3077_v43  ;;  %v1785_v45 = vrot.slane %v1777_v40, %v3077_v43 }
 0x572   : > { %v1795_v46 = vcombine.low %v1776_v41, %v1792_v42  ;;  %v1794_v37 = vcombine.high %v1769_v44, %v1785_v45  ;;  %v1796_v38 = vcombine.high %v1776_v41, %v1792_v42  ;;  %v1793_v47 = vcombine.low %v1769_v44, %v1785_v45 }
 0x574   : > { %1802 = vrot.lane.b32.xlu1 %v1795_v46, %s2673_s18  ;;  %1798 = vrot.lane.b32.xlu0 %v1794_v37, %s2674_s25  ;;  %s3233_s18 = scalar_lea.hbm %s3372_s29, %s2136_s28  ;;  %s1914_s25 = scalar_lea.sflag [#allocation4], %s3004_s3 }
 0x578   : > { %1806 = vrot.lane.b32.xlu1 %v1796_v38, %s2675_s15  ;;  %s2562_s15 = scalar_lea.vmem %s3235_s20, 128 }
 0x579   : > { %p2563_p4 = scmp.ne.s32.totalorder %s3235_s20, %s2562_s15  ;;  %p2570_p6 = scmp.lt.s32.totalorder %s2568_s16, %s2562_s15 }
 0x57b   : > { %p2564_p3 = pnand %p2563_p4, %p3374_p7  ;;  %p2571_p0 = por %p2570_p6, %p2569_p13 }
 0x57d   : > { %p2565_p1 = pneg %p2564_p3 }
 0x57f   : > { %p2572_p12 = pnand %p2571_p0, %p2565_p1 }
 0x5e6   : > { %v1803_v36 = vpop.permute.xlu1 %1802  ;;  %v1799_v50 = vpop.permute.xlu0 %1798 }
 0x5e7   : > { %v1809_v51 = vsel %vm1243_vm2, %v1793_v47, %v1799_v50 }
 0x5e8   : > { %v1811_v53 = vsel %vm1810_vm4, %v1809_v51, %v1803_v36 }
 0x5ea   : > { %v1807_v52 = vpop.permute.xlu1 %1806 }
 0x5eb   : > { %v1813_v54 = vsel %vm1812_vm5, %v1811_v53, %v1807_v52 }
 0x5ec   : > { %v1814_v43 = vpack.c.bf16 %v1813_v54, %v1813_v54 }
 0x5ee   : > { %2244 = vmatmul.mubr.msk.bf16.vlgmr.msra.gmra.mrb[20].mxu1 %vm614_vm1, %v1814_v43 }
 0x6c1   : > { %v1875_v56 = vpop.f32.mrb[20].mxu1 }
 0x6c2   : > { %v1876_v57 = vadd.f32 %v2129_v55, %v1875_v56  ;;  %v2245_v58 = vpop.f32.mrb[21].mxu1 }
 0x6c3   : > { %v1878_v59 = vpop.f32.mrb[22].mxu1 }
 0x6c4   : > { %v2246_v60 = vpop.f32.mrb[23].mxu1  ;;  %v1881_v61 = vadd.f32 %v1876_v57, %v3044_v6  ;;  %v2133_v6 = vld [vmem:[%s3370_s12] ss:$0 sm:$0xff] }
 0x6c6   : > { %v1882_v62 = vsel %vm614_vm1, %v1881_v61, 0.0 }
 0x6c7   : > { %1883 = vadd.xlane.f32.xlu0 %v1882_v62 }
 0x754   : > { %v1884_v63 = vpop.xlane.xlu0 %1883 }
 0x755   : > { %v1886_v1 = vmul.f32 0.03125, %v1884_v63 }
 0x757   : > { %v1887_v48 = vsub.f32 %v1881_v61, %v1886_v1 }
 0x759   : > { %v1888_v2 = vmul.f32 %v1887_v48, %v1887_v48 }
 0x75b   : > { %v1889_v49 = vsel %vm614_vm1, %v1888_v2, 0.0 }
 0x75c   : > { %1890 = vadd.xlane.f32.xlu1 %v1889_v49 }
 0x7e9   : > { %v1891_v3 = vpop.xlane.xlu1 %1890 }
 0x7ea   : > { %v1892_v4 = vmul.f32 0.03125, %v1891_v3 }
 0x7ec   : > { %v1893_v5 = vadd.f32 1e-05, %v1892_v4 }
 0x7ee   : > { %2386 = vrsqrt.f32 %v1893_v5 }
 0x7f8   : > { %v2387_v7 = vpop.eup %2386 }
 0x7f9   : > { %v1895_v8 = vmul.f32 %v2387_v7, %v1887_v48 }
 0x7fb   : > { %v1903_v10 = vmul.f32 %v2133_v6, %v1895_v8 }
 0x7fd   : > { %v1911_v11 = vadd.f32 %v2134_v9, %v1903_v10 }
 0x7ff   : > { %1912 = vst.msk [vmem:[%s585_s30] sm:$0xff] %vm614_vm1, %v1911_v11 }
 0x800   : > { %2575 = shalt.err (!%p2572_p12)
}
 0x801   : > { %s2576_s3 = scalar_lea.hbm %s3233_s18, 128  ;;  %s2580_s22 = scalar_lea.hbm %s3373_s4, 256 }
 0x802   : > { %p2577_p8 = scmp.ne.s32.totalorder %s3233_s18, %s2576_s3  ;;  %p2581_p5 = scmp.lt.u32.totalorder %s3233_s18, %s3373_s4 }
 0x803   : > { %p2582_p9 = scmp.lt.u32.totalorder %s2580_s22, %s2576_s3  ;;  %p2584_p4 = scmp.lt.u32.totalorder %s2576_s3, %s3233_s18 }
 0x804   : > { %p2578_p11 = pnand %p2577_p8, %p3374_p7 }
 0x805   : > { %p2583_p2 = por %p2582_p9, %p2581_p5 }
 0x806   : > { %p2579_p10 = pneg %p2578_p11 }
 0x807   : > { %p2585_p3 = por %p2584_p4, %p2583_p2 }
 0x809   : > { %p2586_p1 = pnand %p2585_p3, %p2579_p10 }
 0x80b   : > { %2589 = shalt.err (!%p2586_p1)
}
 0x80c   : > { %2265 = dma.vmem_to_hbm [thread:$0]  (%p3374_p7), %s3235_s20, 128, %s3233_s18, %s1914_s25  }
 0x80d PF: > { %s3375_s11 = sld [smem:[#allocation19_spill]]  ;;  %s3376_s10 = sld [smem:[#allocation23_spill]] }
 0x80e   : > { %s3377_s19 = sld [smem:[#allocation22_spill]] }
 0x813   : > { %s1940_s28 = sand.u32 1, %s3375_s11   ;;  %p3378_p13 = scmp.ne.s32.totalorder %s3376_s10, 0 }
 0x814   : > { %p3379_p6 = scmp.ge.s32.totalorder %s3377_s19, 2  ;;  %s1941_s30 = scalar_lea.sflag [#allocation4], %s1940_s28 }
 0x816   : > { %p2288_p0 = pnand %p3379_p6, %p3378_p13 }
 0x818   : > { %2631 = dma.done.wait (!%p2288_p0), %s1941_s30, 128  }
 0x819   : > { %2633 = vsyncadd (!%p2288_p0), %s1941_s30, 4294967168  ;;  %s34_s30 = sadd.s32 1, %s3377_s19   ;;  %s3380_s21 = sld [smem:[#allocation26_spill]] }
 0x81a   : > { %p31_p12 = scmp.ge.s32.totalorder %s34_s30, 4   ;;  %s3381_s28 = sld [smem:[#allocation21_spill]] }
 0x81b   : > { %s3382_s29 = sld [smem:[#allocation24_spill]]  ;;  %s3383_s25 = smov %s2640_s26 }
 0x81c   : > { %s3384_s26 = smov %s2644_s27  ;;  %33 = sbr.rel (!%p31_p12) target bundleno = 20 (0x14), region = 153 }
 0x81f   : > { %s3385_s27 = smov %s3380_s21 }
 0x823   :  { %1946 = vsyncpa [#allocation3], 1 }
 0x824   :  { %1948 = vsyncpa [#allocation3 + $0x1], 1 }
 0x825   :  { %1949 = vsyncpa [#allocation6], 1 }
 0x826   :  { %1951 = vsyncpa [#allocation6 + $0x1], 1 }
 0x827   :  { %1952 = vsyncpa [#allocation9], 1 }
 0x828   :  { %1953 = vsyncpa [#allocation12], 1 }
 0x829   :  { %1954 = vsyncpa [#allocation4], 1 }
 0x82a   :  { %1956 = vsyncpa [#allocation4 + $0x1], 1 }

</bundles_post_ra>
